<compile_context>
chip_gen: v7x
topology: tpu7x:2x2x1
jax: 0.10.0
libtpu: 0.0.40
codegen_flags: <defaults>
</compile_context>

<pallas_src>
import functools

import numpy as np
import jax
import jax.numpy as jnp
from jax.experimental import pallas as pl
from jax.experimental.pallas import tpu as pltpu

# ------------------------- problem sizes (small, deterministic) -------------------------
BATCH = 8                 # consecutive time steps in one batch (module uses w[1:], fo[:-1])
COIN = 4                  # number of risky assets
FEAT = 3                  # features per asset; feature 0 is the relative close price
CASH_COIN = COIN + 1      # portfolio width: cash slot + coins

COMMISSION_RATIO = 0.0025
INTEREST_RATE = 0.001 / 24 / 2   # mirrors daily_interest_rate / 24 / 2

# gamma / beta / size_average from __init__ do not affect the returned values
# (both branches of the if return the same tuple), so they are not parameters here.


# ----------------------------------- the Pallas kernel ----------------------------------
def _batch_loss_kernel(w_ref, cp_ref, out_ref, *, commission_ratio, interest_rate):
    # w_ref  : (B, coin+1) portfolio weights (cash first)
    # cp_ref : (B, coin+1) close prices with the ones column already prepended
    # out_ref: (1, 2)      [loss, portfolio_value]
    B, _ = w_ref.shape
    w = w_ref[...]
    cp = cp_ref[...]

    # element_reward and reward = w . close_price  (lane reduction, no MXU needed)
    er = w * cp                                              # (B, C1)
    reward = jnp.sum(er, axis=1, keepdims=True)              # (B, 1)

    # interest: sum of the negative element rewards * interest_rate
    interest = jnp.sum(jnp.minimum(er, 0.0), axis=1, keepdims=True) * interest_rate

    # future_omega = element_reward / reward  (division -> EUP reciprocal + multiply)
    inv_reward = pl.reciprocal(reward, approx=True)          # (B, 1)
    fo = er * inv_reward                                     # (B, C1)

    # pair future_omega[i-1] with w[i]: shift fo down one batch row using a
    # subdiagonal 0/1 matrix (row 0 is masked to 1 below, matching the cat([ones, ...])).
    r = jax.lax.broadcasted_iota(jnp.int32, (B, B), 0)
    c = jax.lax.broadcasted_iota(jnp.int32, (B, B), 1)
    shift = (r == c + 1).astype(jnp.float32)                 # S[i, i-1] = 1
    fo_prev = jnp.dot(shift, fo, preferred_element_type=jnp.float32)   # row i = fo[i-1]

    absdiff = jnp.sum(jnp.abs(fo_prev - w), axis=1, keepdims=True)     # (B, 1)
    row = jax.lax.broadcasted_iota(jnp.int32, (B, 1), 0)
    pure_pc = jnp.where(row == 0, 1.0, 1.0 - absdiff * commission_ratio)

    reward = reward * pure_pc + interest                     # (B, 1)

    # loss = mean(-log(reward));  portfolio_value = prod(reward over batch)
    log_r = jnp.log(reward)                                  # (B, 1)
    s = jnp.sum(log_r, axis=0, keepdims=True)                # (1, 1)
    loss = -s * (1.0 / B)                                    # (1, 1)
    # TODO(synk): Mosaic has no native product-reduction; prod(reward) is computed as
    # exp(sum(log(reward))), identical whenever every per-step reward is positive
    # (which is required anyway for -log(reward) to be finite).
    pv = jnp.exp(s)                                          # (1, 1)

    # single lane-packed store: out = [loss, portfolio_value]
    lane = jax.lax.broadcasted_iota(jnp.int32, (1, 2), 1)
    out_ref[...] = jnp.where(lane == 0, loss, pv)


# ------------------------------------- wrapper -------------------------------------------
def batch_loss_forward(w, y, commission_ratio=COMMISSION_RATIO, interest_rate=INTEREST_RATE):
    """Mirrors Batch_Loss.forward(w, y); returns (loss, portfolio_value) as scalars.

    w: (B, 1, coin+1) portfolio weights (cash first), y: (B, coin, feature)."""
    B = w.shape[0]
    c1 = w.shape[2]
    assert y.shape[1] == c1 - 1

    # Module's own tensor prep: close_price = cat([ones, y[:, :, 0:1]], 1) -> lane-dense (B, C1)
    close = jnp.concatenate(
        [jnp.ones((B, 1), jnp.float32), y[:, :, 0].astype(jnp.float32)], axis=1)
    w2 = jnp.reshape(w.astype(jnp.float32), (B, c1))   # metadata-only reshape

    kernel = functools.partial(_batch_loss_kernel,
                               commission_ratio=float(commission_ratio),
                               interest_rate=float(interest_rate))

    out = pl.pallas_call(
        kernel,
        out_shape=jax.ShapeDtypeStruct((1, 2), jnp.float32),
        in_specs=[pl.BlockSpec(memory_space=pltpu.MemorySpace.VMEM),
                  pl.BlockSpec(memory_space=pltpu.MemorySpace.VMEM)],
        out_specs=pl.BlockSpec(memory_space=pltpu.MemorySpace.VMEM),
    )(w2, close)

    return out[0, 0], out[0, 1]


# --------------------------- pure-JAX reference (for the check) ---------------------------
def _reference_batch_loss(w, y, commission_ratio, interest_rate):
    B = w.shape[0]
    close_price = y[:, :, 0:1]
    close_price = jnp.concatenate(
        [jnp.ones((B, 1, 1), close_price.dtype), close_price], axis=1)          # (B, C1, 1)
    reward = jnp.matmul(w, close_price)                                          # (B, 1, 1)
    close_t = jnp.reshape(close_price, (B, 1, close_price.shape[1]))             # (B, 1, C1)
    element_reward = w * close_t
    interest = jnp.sum(jnp.where(element_reward < 0, element_reward, 0.0),
                       axis=2, keepdims=True) * interest_rate
    future_omega = element_reward / reward
    wt, wt1 = future_omega[:-1], w[1:]
    pure_pc = 1.0 - jnp.sum(jnp.abs(wt - wt1), axis=-1) * commission_ratio       # (B-1, 1)
    pure_pc = jnp.concatenate([jnp.ones((1, 1), pure_pc.dtype), pure_pc], axis=0)
    pure_pc = jnp.reshape(pure_pc, (B, 1, 1))
    reward = reward * pure_pc + interest
    portfolio_value = jnp.prod(reward, axis=0)[0, 0]
    loss = jnp.mean(-jnp.log(reward))
    return loss, portfolio_value


# --------------------------------------- main ---------------------------------------------
if __name__ == "__main__":
    key = jax.random.PRNGKey(0)
    kw, ky = jax.random.split(key)

    # deterministic small inputs: softmax portfolio weights, relative prices near 1
    w = jax.nn.softmax(jax.random.normal(kw, (BATCH, 1, CASH_COIN), jnp.float32), axis=-1)
    y = jax.random.uniform(ky, (BATCH, COIN, FEAT), jnp.float32, minval=0.9, maxval=1.1)

    loss, pv = batch_loss_forward(w, y)
    loss, pv = jax.block_until_ready((loss, pv))

    ref_loss, ref_pv = _reference_batch_loss(w, y, COMMISSION_RATIO, INTEREST_RATE)
    assert np.isfinite(float(loss)) and np.isfinite(float(pv)), (loss, pv)
    assert np.allclose(float(loss), float(ref_loss), rtol=5e-3, atol=5e-5), (float(loss), float(ref_loss))
    assert np.allclose(float(pv), float(ref_pv), rtol=5e-3, atol=5e-5), (float(pv), float(ref_pv))
    print("KERNEL_OK")
</pallas_src>

<mosaic_0001>
module attributes {stable_mosaic.version = 11 : i64} {
  func.func @_batch_loss_kernel(%arg0: memref<8x5xf32, #tpu.memory_space<vmem>>, %arg1: memref<8x5xf32, #tpu.memory_space<vmem>>, %arg2: memref<1x2xf32, #tpu.memory_space<vmem>>) attributes {dimension_semantics = [], scalar_prefetch = 0 : i64, scratch_operands = 0 : i64, tpu.core_type = #tpu.core_type<tc>} {
    %c0 = arith.constant 0 : index
    %c0_0 = arith.constant 0 : index
    %0 = vector.load %arg0[%c0, %c0_0] : memref<8x5xf32, #tpu.memory_space<vmem>>, vector<8x5xf32>
    %c0_1 = arith.constant 0 : index
    %c0_2 = arith.constant 0 : index
    %1 = vector.load %arg1[%c0_1, %c0_2] : memref<8x5xf32, #tpu.memory_space<vmem>>, vector<8x5xf32>
    %2 = arith.mulf %0, %1 : vector<8x5xf32>
    %cst = arith.constant dense<0.000000e+00> : vector<8xf32>
    %3 = vector.multi_reduction <add>, %2, %cst [1] : vector<8x5xf32> to vector<8xf32>
    %4 = vector.shape_cast %3 : vector<8xf32> to vector<8x1xf32>
    %cst_3 = arith.constant 0.000000e+00 : f32
    %5 = vector.broadcast %cst_3 : f32 to vector<8x5xf32>
    %6 = arith.minimumf %2, %5 : vector<8x5xf32>
    %cst_4 = arith.constant dense<0.000000e+00> : vector<8xf32>
    %7 = vector.multi_reduction <add>, %6, %cst_4 [1] : vector<8x5xf32> to vector<8xf32>
    %8 = vector.shape_cast %7 : vector<8xf32> to vector<8x1xf32>
    %cst_5 = arith.constant 2.08333331E-5 : f32
    %9 = vector.broadcast %cst_5 : f32 to vector<8x1xf32>
    %10 = arith.mulf %8, %9 : vector<8x1xf32>
    %11 = tpu.reciprocal %4 {approx = true} : vector<8x1xf32> -> vector<8x1xf32>
    %12 = vector.broadcast %11 : vector<8x1xf32> to vector<8x5xf32>
    %13 = arith.mulf %2, %12 : vector<8x5xf32>
    %14 = tpu.iota {dimensions = array<i32: 0>} : vector<8x8xi32>
    %15 = tpu.iota {dimensions = array<i32: 1>} : vector<8x8xi32>
    %c1_i32 = arith.constant 1 : i32
    %16 = vector.broadcast %c1_i32 : i32 to vector<8x8xi32>
    %17 = arith.addi %15, %16 : vector<8x8xi32>
    %18 = arith.cmpi eq, %14, %17 : vector<8x8xi32>
    %19 = arith.extui %18 : vector<8x8xi1> to vector<8x8xi32>
    %20 = arith.sitofp %19 : vector<8x8xi32> to vector<8x8xf32>
    %cst_6 = arith.constant dense<0.000000e+00> : vector<8x5xf32>
    %21 = tpu.matmul %20, %13, %cst_6 {dimension_numbers = #tpu.dot_dimension_numbers<[1], [0], [0], [1], [0, 0, 1, 1], [], []>} : vector<8x8xf32>, vector<8x5xf32>, vector<8x5xf32> -> vector<8x5xf32>
    %22 = arith.subf %21, %0 : vector<8x5xf32>
    %23 = math.absf %22 : vector<8x5xf32>
    %cst_7 = arith.constant dense<0.000000e+00> : vector<8xf32>
    %24 = vector.multi_reduction <add>, %23, %cst_7 [1] : vector<8x5xf32> to vector<8xf32>
    %25 = vector.shape_cast %24 : vector<8xf32> to vector<8x1xf32>
    %26 = tpu.iota {dimensions = array<i32: 0>} : vector<8x1xi32>
    %c0_i32 = arith.constant 0 : i32
    %27 = vector.broadcast %c0_i32 : i32 to vector<8x1xi32>
    %28 = arith.cmpi eq, %26, %27 : vector<8x1xi32>
    %cst_8 = arith.constant 2.500000e-03 : f32
    %29 = vector.broadcast %cst_8 : f32 to vector<8x1xf32>
    %30 = arith.mulf %25, %29 : vector<8x1xf32>
    %cst_9 = arith.constant 1.000000e+00 : f32
    %31 = vector.broadcast %cst_9 : f32 to vector<8x1xf32>
    %32 = arith.subf %31, %30 : vector<8x1xf32>
    %cst_10 = arith.constant 1.000000e+00 : f32
    %33 = vector.broadcast %cst_10 : f32 to vector<8x1xf32>
    %34 = arith.select %28, %33, %32 : vector<8x1xi1>, vector<8x1xf32>
    %35 = arith.mulf %4, %34 : vector<8x1xf32>
    %36 = arith.addf %35, %10 : vector<8x1xf32>
    %37 = math.log %36 : vector<8x1xf32>
    %cst_11 = arith.constant dense<0.000000e+00> : vector<1xf32>
    %38 = vector.multi_reduction <add>, %37, %cst_11 [0] : vector<8x1xf32> to vector<1xf32>
    %39 = vector.shape_cast %38 : vector<1xf32> to vector<1x1xf32>
    %cst_12 = arith.constant 0.000000e+00 : f32
    %40 = vector.broadcast %cst_12 : f32 to vector<1x1xf32>
    %41 = arith.subf %40, %39 : vector<1x1xf32>
    %cst_13 = arith.constant 1.250000e-01 : f32
    %42 = vector.broadcast %cst_13 : f32 to vector<1x1xf32>
    %43 = arith.mulf %41, %42 : vector<1x1xf32>
    %44 = math.exp %39 : vector<1x1xf32>
    %45 = tpu.iota {dimensions = array<i32: 1>} : vector<1x2xi32>
    %c0_i32_14 = arith.constant 0 : i32
    %46 = vector.broadcast %c0_i32_14 : i32 to vector<1x2xi32>
    %47 = arith.cmpi eq, %45, %46 : vector<1x2xi32>
    %48 = vector.shape_cast %43 : vector<1x1xf32> to vector<1x1xf32>
    %49 = vector.broadcast %48 : vector<1x1xf32> to vector<1x2xf32>
    %50 = vector.shape_cast %44 : vector<1x1xf32> to vector<1x1xf32>
    %51 = vector.broadcast %50 : vector<1x1xf32> to vector<1x2xf32>
    %52 = arith.select %47, %49, %51 : vector<1x2xi1>, vector<1x2xf32>
    %c0_15 = arith.constant 0 : index
    %c0_16 = arith.constant 0 : index
    %53 = vector.load %arg2[%c0_15, %c0_16] : memref<1x2xf32, #tpu.memory_space<vmem>>, vector<1x2xf32>
    tpu.vector_store %arg2[%c0_15, %c0_16], %52 {strides = array<i32>} : memref<1x2xf32, #tpu.memory_space<vmem>>, vector<1x2xf32>,
    return
  }
}

</mosaic_0001>

<bundles_post_ra>
// kernel: tpu_custom_call.1
= control target key start
LH: loop header
LB: loop body
LE: loop exit
PB: predicated region body
PF: predicated region fallthrough
CT: control target
= control target key end

     0   :  { %7 = vsyncpa [#allocation3], 0  ;;  %s326_s0 = inlined_call_operand.hbm [shape: f32[8,5], index: 0, kind: input, shape index: {}]   ;;  %s327_s1 = inlined_call_operand.hbm [shape: f32[8,5], index: 1, kind: input, shape index: {}]   ;;  %s328_s2 = inlined_call_operand.hbm [shape: f32[1,2], index: 2, kind: output, shape index: {}]  }
   0x1   :  { %8 = vsyncpa [#allocation6], 0 }
   0x2   :  { %9 = vsyncpa [#allocation4], 0  ;;  %s267_s9 = smov [#allocation2]   ;;  %s268_s11 = smov [#allocation5]  }
   0x3   :  { %s16_s10 = sshll.u32 %s267_s9, 4  ;;  %s26_s12 = sshll.u32 %s268_s11, 4  ;;  %s17_s10 = int_to_ptr.vmem [resolvable:$true] %s16_s10  ;;  %s27_s12 = int_to_ptr.vmem [resolvable:$true] %s26_s12 }
   0x4   :  { %s195_s15 = scalar_lea.hbm %s326_s0, 128 }
   0x5   :  { %p196_p0 = scmp.ne.s32.totalorder %s326_s0, %s195_s15  ;;  %p199_p1 = scmp.lt.u32.totalorder %s195_s15, %s326_s0 }
   0x7   :  { %p201_p2 = pnand %p199_p1, %p196_p0 }
   0x9   :  { %204 = shalt.err (!%p201_p2)
}
   0xa   :  { %s205_s20 = scalar_lea.vmem %s17_s10, 128  ;;  %p210_p4 = scmp.lt.s32.totalorder %s17_s10, %s17_s10 }
   0xb   :  { %p206_p3 = scmp.ne.s32.totalorder %s17_s10, %s205_s20  ;;  %p211_p5 = scmp.lt.s32.totalorder %s205_s20, %s205_s20 }
   0xd   :  { %p212_p6 = por %p211_p5, %p210_p4 }
   0xf   :  { %p213_p7 = pnand %p212_p6, %p206_p3 }
  0x11   :  { %216 = shalt.err (!%p213_p7)
}
  0x12   :  { %19 = dma.hbm_to_vmem [thread:$0]  %s326_s0, 128, %s17_s10, [#allocation3]  }
  0x13   :  { %s217_s25 = scalar_lea.hbm %s327_s1, 128 }
  0x14   :  { %p218_p8 = scmp.ne.s32.totalorder %s327_s1, %s217_s25  ;;  %p221_p9 = scmp.lt.u32.totalorder %s217_s25, %s327_s1 }
  0x16   :  { %p223_p10 = pnand %p221_p9, %p218_p8 }
  0x18   :  { %226 = shalt.err (!%p223_p10)
}
  0x19   :  { %s227_s30 = scalar_lea.vmem %s27_s12, 128  ;;  %p232_p12 = scmp.lt.s32.totalorder %s27_s12, %s27_s12 }
  0x1a   :  { %p228_p11 = scmp.ne.s32.totalorder %s27_s12, %s227_s30  ;;  %p233_p13 = scmp.lt.s32.totalorder %s227_s30, %s227_s30 }
  0x1c   :  { %p234_p0 = por %p233_p13, %p232_p12 }
  0x1e   :  { %p235_p1 = pnand %p234_p0, %p228_p11 }
  0x20   :  { %238 = shalt.err (!%p235_p1)
}
  0x21   :  { %29 = dma.hbm_to_vmem [thread:$0]  %s327_s1, 128, %s27_s12, [#allocation6]  }
  0x22   :  { %261 = dma.done.wait [#allocation3], 128  }
  0x23   :  { %262 = vsyncadd [#allocation3], 4294967168 }
  0x24   :  { %263 = dma.done.wait [#allocation6], 128  }
  0x25   :  { %264 = vsyncadd [#allocation6], 4294967168  ;;  %v36_v0 = vld [vmem:[#allocation2] sm:$0xff]  ;;  %v37_v1 = vld [vmem:[#allocation5] sm:$0xff]  ;;  %vm39_vm0 = vcmask 39936   ;;  %v269_v4 = vmov 0.0   ;;  %v50_v5 = vlaneseq }
  0x26   :  { %v38_v2 = vmul.f32 %v37_v1, %v36_v0  ;;  %179 = vmatprep.subr.mxu0 %v269_v4  ;;  %vm270_vm1 = vmmov 0   ;;  %vm58_vm3 = vcmask 64512   ;;  %s271_s1 = smov [#allocation7]   ;;  %vm157_vm6 = vcmask 8192  }
  0x27   :  { %181 = vmatprep.mubr.msk.f32.mxu0 %vm270_vm1, %v269_v4  ;;  %v53_v7 = vand.u32 127, %v50_v5  ;;  %v51_v8 = vshrl.u32 %v50_v5, 7  ;;  %s165_s4 = sshll.u32 %s271_s1, 4  ;;  %s166_s4 = int_to_ptr.vmem [resolvable:$true] %s165_s4 }
  0x28   :  { %v40_v3 = vsel %vm39_vm0, %v38_v2, 0.0  ;;  %v43_v13 = vmin.f32 %v38_v2, 0.0  ;;  %s239_s5 = scalar_lea.vmem %s166_s4, 16  ;;  %s243_s6 = scalar_lea.vmem %s166_s4, 32 }
  0x29   :  { %41 = vadd.xlane.f32.xlu0 %v40_v3  ;;  %v54_v9 = vadd.s32 1, %v53_v7  ;;  %vm137_vm4 = vcmp.eq.s32.totalorder %v51_v8, 0  ;;  %vm155_vm5 = vcmp.eq.s32.totalorder %v53_v7, 0  ;;  %p240_p2 = scmp.ne.s32.totalorder %s166_s4, %s239_s5  ;;  %p244_p3 = scmp.lt.s32.totalorder %s166_s4, %s166_s4 }
  0x2a   :  { %v44_v14 = vsel %vm39_vm0, %v43_v13, 0.0  ;;  %p245_p4 = scmp.lt.s32.totalorder %s243_s6, %s239_s5 }
  0x2b   :  { %vm55_vm2 = vcmp.eq.s32.totalorder %v51_v8, %v54_v9  ;;  %45 = vadd.xlane.f32.xlu1 %v44_v14 }
  0x2c   :  { %v175_v12 = vsel %vm55_vm2, 1.0, %v269_v4  ;;  %p246_p5 = por %p245_p4, %p244_p3 }
  0x2e   :  { %p247_p6 = pnand %p246_p5, %p240_p2 }
  0xb6   :  { %v42_v6 = vpop.xlane.xlu0 %41 }
  0xb7   :  { %189 = vrcp.f32 %v42_v6 }
  0xb8   :  { %v46_v22 = vpop.xlane.xlu1 %45 }
  0xb9   :  { %v47_v24 = vmul.f32 2.0833333e-05, %v46_v22 }
  0xc1   :  { %v190_v10 = vpop.eup %189 }
  0xc2   :  { %v49_v11 = vmul.f32 %v190_v10, %v38_v2 }
  0xc4   :  { %180 = vmatpush3.msra.mxu0 %v49_v11 }
  0xc5   :  { %182 = vmatmul.mubr.msk.f32.vlgmr.msra.gmra.mrb[0].mxu0 %vm58_vm3, %v175_v12 }
 0x198   :  { %v128_v15 = vpop.f32.mrb[0].mxu0 }
 0x199   :  { %v132_v16 = vsub.f32 %v128_v15, %v36_v0  ;;  %v183_v17 = vpop.f32.mrb[1].mxu0 }
 0x19b   :  { %v133_v18 = vand.u32 2147483647, %v132_v16 }
 0x19d   :  { %v134_v19 = vsel %vm39_vm0, %v133_v18, 0.0 }
 0x19e   :  { %135 = vadd.xlane.f32.xlu0 %v134_v19 }
 0x22b   :  { %v136_v20 = vpop.xlane.xlu0 %135 }
 0x22c   :  { %v138_v21 = vmul.f32 0.0025, %v136_v20 }
 0x22e   :  { %v139_v23 = vsub.f32 1.0, %v138_v21 }
 0x230   :  { %v140_v25 = vsel %vm137_vm4, 1.0, %v139_v23 }
 0x231   :  { %v141_v26 = vmul.f32 %v140_v25, %v42_v6 }
 0x233   :  { %v142_v27 = vadd.f32 %v141_v26, %v47_v24 }
 0x235   :  { %191 = vlog2.f32 %v142_v27 }
 0x23f   :  { %v192_v28 = vpop.eup %191 }
 0x240   :  { %v144_v29 = vmul.f32 0.6931472, %v192_v28 }
 0x242   :  { %v145_v30 = vrot.slane %v144_v29, 4 }
 0x244   :  { %v146_v31 = vadd.f32 %v145_v30, %v144_v29 }
 0x246   :  { %v147_v32 = vrot.slane %v146_v31, 2 }
 0x248   :  { %v148_v33 = vadd.f32 %v147_v32, %v146_v31 }
 0x24a   :  { %v149_v34 = vrot.slane %v148_v33, 1 }
 0x24c   :  { %v150_v35 = vadd.f32 %v149_v34, %v148_v33 }
 0x24e   :  { %v153_v36 = vmul.f32 1.442695, %v150_v35  ;;  %v151_v37 = vsub.f32 0.0, %v150_v35 }
 0x250   :  { %193 = vpow2.f32 %v153_v36  ;;  %v152_v38 = vmul.f32 0.125, %v151_v37 }
 0x25a   :  { %v194_v39 = vpop.eup %193 }
 0x25b   :  { %v156_v40 = vsel %vm155_vm5, %v152_v38, %v194_v39 }
 0x25c   :  { %158 = vst.msk [vmem:[#allocation7] sm:$0x1] %vm157_vm6, %v156_v40 }
 0x25d   :  { %250 = shalt.err (!%p247_p6)
}
 0x25e   :  { %s251_s9 = scalar_lea.hbm %s328_s2, 16 }
 0x25f   :  { %p252_p7 = scmp.ne.s32.totalorder %s328_s2, %s251_s9  ;;  %p255_p8 = scmp.lt.u32.totalorder %s251_s9, %s328_s2 }
 0x261   :  { %p257_p9 = pnand %p255_p8, %p252_p7 }
 0x263   :  { %260 = shalt.err (!%p257_p9)
}
 0x264   :  { %168 = dma.vmem_to_hbm [thread:$0]  %s166_s4, 16, %s328_s2, [#allocation4]  }
 0x265   :  { %265 = dma.done.wait [#allocation4], 16  }
 0x266   :  { %266 = vsyncadd [#allocation4], 4294967280 }
 0x267   :  { %172 = vsyncpa [#allocation3], 1 }
 0x268   :  { %173 = vsyncpa [#allocation6], 1 }
 0x269   :  { %174 = vsyncpa [#allocation4], 1 }

</bundles_post_ra>
